<compile_context>
chip_gen: v6e
topology: v6e:2x2x1
jax: 0.10.0
libtpu: 0.0.40
codegen_flags: <defaults>
</compile_context>

<pallas_src>
import functools
from typing import NamedTuple

import jax
import jax.numpy as jnp
from jax.experimental import pallas as pl
from jax.experimental.pallas import tpu as pltpu


def _round_up(x, m):
    return ((x + m - 1) // m) * m


def _choose_tile(size, candidates):
    """Pick the tile (from descending `candidates`) minimizing padding; ties
    go to the largest tile. Returns (tile, padded_size)."""
    best, best_padded = None, None
    for c in candidates:
        p = _round_up(size, c)
        if best_padded is None or p < best_padded:
            best, best_padded = c, p
    return best, best_padded


class LinearMeta(NamedTuple):
    k: int          # logical in_features
    n: int          # logical hidden (out_features)
    tk: int         # K tile
    tn: int         # N tile
    use_bf16: bool  # bf16 operands / f32 accumulation


def prepare_linear_params(w, b, *, use_bf16=True):
    """One-time weight prep (pad to (8,128)-aligned, cast). Do this OUTSIDE
    the per-call path and reuse the returned arrays for every forward call.

    w: (in_features, hidden) f32,  b: (hidden,) f32
    returns: wp (Kp, Np) bf16/f32, bp (1, Np) f32, meta (static)
    """
    K, N = w.shape
    in_dtype = jnp.bfloat16 if use_bf16 else jnp.float32

    Kp128 = _round_up(K, 128)
    Np128 = _round_up(N, 128)
    TK, Kp = _choose_tile(Kp128, (2048, 1024, 512, 256, 128))
    TN, Np = _choose_tile(Np128, (512, 256, 128))

    wp = jnp.zeros((Kp, Np), in_dtype).at[:K, :N].set(w.astype(in_dtype))
    bp = jnp.zeros((1, Np), jnp.float32).at[0, :N].set(b.astype(jnp.float32))
    return wp, bp, LinearMeta(k=K, n=N, tk=TK, tn=TN, use_bf16=use_bf16)


def _linear_kernel(x_ref, w_ref, b_ref, o_ref, acc_ref):
    # x_ref: (TM, TK)   w_ref: (TK, TN)   b_ref: (1, TN) f32
    # o_ref: (TM, TN) f32   acc_ref: (TM, TN) f32 scratch
    k = pl.program_id(2)

    @pl.when(k == 0)
    def _():
        acc_ref[...] = jnp.zeros_like(acc_ref)

    acc_ref[...] += jnp.dot(
        x_ref[...], w_ref[...], preferred_element_type=jnp.float32)

    @pl.when(k == pl.num_programs(2) - 1)
    def _():
        o_ref[...] = (acc_ref[...] + b_ref[...]).astype(o_ref.dtype)


@functools.partial(jax.jit, static_argnames=("meta",))
def my_compound_forward(x, wp, bp, meta):
    """Equivalent of MyCompoundClass.forward with layer = Linear.

    x:  (batch, seq, in_features) f32
    wp: (Kp, Np) prepared weight (from prepare_linear_params)
    bp: (1, Np)  prepared bias
    returns: (batch, hidden) f32 == Linear(x)[:, -1, :]
    """
    B, S, K = x.shape
    Kp, Np = wp.shape
    assert K == meta.k
    N, TK, TN = meta.n, meta.tk, meta.tn
    in_dtype = jnp.bfloat16 if meta.use_bf16 else jnp.float32

    # ---- glue: select last timestep BEFORE the matmul (S x less work) ----
    x_last = x[:, -1, :]                                   # (B, K)

    # ---- adaptive M tiling: single M tile whenever B <= 512 --------------
    if B <= 512:
        TM = _round_up(B, 8)
        Mp = TM
    else:
        TM, Mp = _choose_tile(B, (512, 256, 128, 64))

    # ---- pad/cast x only when actually needed ----------------------------
    if Mp == B and Kp == K:
        xp = x_last.astype(in_dtype)
    else:
        xp = jnp.zeros((Mp, Kp), in_dtype).at[:B, :K].set(
            x_last.astype(in_dtype))

    n_tiles_n = Np // TN
    n_tiles_m = Mp // TM
    n_tiles_k = Kp // TK
    # Grid order (N, M, K): K innermost (reduction / accumulator), M second —
    # when n_tiles_k == 1 the weight block index is constant across the M axis
    # so its DMA is skipped (weight streamed once per N tile).
    grid = (n_tiles_n, n_tiles_m, n_tiles_k)

    isize = jnp.dtype(in_dtype).itemsize
    cost = pl.CostEstimate(
        flops=2 * Mp * Np * Kp,
        transcendentals=0,
        bytes_accessed=(Mp * Kp * isize
                        + Kp * Np * isize * (n_tiles_m if n_tiles_k > 1 else 1)
                        + Np * 4 + Mp * Np * 4),
    )
    # Scoped-VMEM budget sized from actual (double-buffered) block bytes.
    block_bytes = (2 * (TM * TK + TK * TN) * isize   # double-buffered inputs
                   + 2 * TM * TN * 4                 # double-buffered output
                   + TM * TN * 4                     # accumulator scratch
                   + 2 * TN * 4)                     # bias
    vmem_limit = int(min(64 * 2**20, max(32 * 2**20, 2 * block_bytes)))

    out = pl.pallas_call(
        _linear_kernel,
        out_shape=jax.ShapeDtypeStruct((Mp, Np), jnp.float32),
        grid_spec=pltpu.PrefetchScalarGridSpec(
            num_scalar_prefetch=0,
            grid=grid,
            in_specs=[
                pl.BlockSpec((TM, TK), lambda j, i, k: (i, k)),   # x tile
                pl.BlockSpec((TK, TN), lambda j, i, k: (k, j)),   # w tile
                pl.BlockSpec((1, TN), lambda j, i, k: (0, j)),    # bias tile
            ],
            out_specs=pl.BlockSpec((TM, TN), lambda j, i, k: (i, j)),
            scratch_shapes=[pltpu.VMEM((TM, TN), jnp.float32)],
        ),
        compiler_params=pltpu.CompilerParams(
            dimension_semantics=("parallel", "parallel", "arbitrary"),
            vmem_limit_bytes=vmem_limit,
        ),
        cost_estimate=cost,
    )(xp, wp, bp)

    # ---- strip alignment padding only when it exists ----------------------
    if Mp == B and Np == N:
        return out
    return out[:B, :N]


if __name__ == "__main__":
    # Small shapes consistent with the forward: (batch, seq, in_features)
    batch, seq, in_features, hidden = 2, 8, 32, 32

    key = jax.random.PRNGKey(0)
    kx, kw, kb = jax.random.split(key, 3)

    x = jax.random.normal(kx, (batch, seq, in_features), dtype=jnp.float32)
    # Deterministic "Linear" parameters (synthetic init, no checkpoint load).
    w = jax.random.normal(kw, (in_features, hidden), dtype=jnp.float32) * 0.02
    b = jax.random.normal(kb, (hidden,), dtype=jnp.float32) * 0.02

    # One-time weight prep (hoisted out of the per-call path).
    wp, bp, meta = prepare_linear_params(w, b, use_bf16=True)
    wp, bp = jax.block_until_ready((wp, bp))

    out = my_compound_forward(x, wp, bp, meta)
    out = jax.block_until_ready(out)

    # Sanity check against pure-JAX f32 reference. Tolerance reflects the
    # explicit bf16-operand / f32-accumulation precision choice above.
    ref = (jnp.einsum("bsk,kn->bsn", x, w) + b)[:, -1, :]
    assert out.shape == (batch, hidden)
    assert jnp.allclose(out, ref, atol=2e-2, rtol=2e-2), (
        float(jnp.max(jnp.abs(out - ref))))

    # Also verify the exact-f32 path once (tight tolerance).
    wp32, bp32, meta32 = prepare_linear_params(w, b, use_bf16=False)
    out32 = jax.block_until_ready(my_compound_forward(x, wp32, bp32, meta32))
    assert jnp.allclose(out32, ref, atol=1e-5, rtol=1e-5), (
        float(jnp.max(jnp.abs(out32 - ref))))

    print("KERNEL_OK")
</pallas_src>

<mosaic_0001>
module attributes {stable_mosaic.version = 11 : i64} {
  func.func @_linear_kernel(%arg0: i32, %arg1: i32, %arg2: i32, %arg3: memref<8x128xbf16, #tpu.memory_space<vmem>>, %arg4: memref<128x128xbf16, #tpu.memory_space<vmem>>, %arg5: memref<1x128xf32, #tpu.memory_space<vmem>>, %arg6: memref<8x128xf32, #tpu.memory_space<vmem>>, %arg7: memref<8x128xf32, #tpu.memory_space<vmem>>) attributes {dimension_semantics = [#tpu.dimension_semantics<parallel>, #tpu.dimension_semantics<parallel>, #tpu.dimension_semantics<arbitrary>], iteration_bounds = array<i64: 1, 1, 1>, scalar_prefetch = 0 : i64, scratch_operands = 1 : i64, tpu.core_type = #tpu.core_type<tc>, window_params = [{transform_indices = @transform_0, window_bounds = array<i64: 8, 128>}, {transform_indices = @transform_1, window_bounds = array<i64: 128, 128>}, {transform_indices = @transform_2, window_bounds = array<i64: 1, 128>}, {transform_indices = @transform_3, window_bounds = array<i64: 8, 128>}]} {
    %c0_i32 = arith.constant 0 : i32
    %0 = arith.cmpi eq, %arg2, %c0_i32 : i32
    %1 = arith.extui %0 : i1 to i32
    %c0_i32_0 = arith.constant 0 : i32
    %2 = arith.cmpi ne, %1, %c0_i32_0 : i32
    scf.if %2 {
      %cst_10 = arith.constant 0.000000e+00 : f32
      %12 = vector.broadcast %cst_10 : f32 to vector<8x128xf32>
      %c0_11 = arith.constant 0 : index
      %c0_12 = arith.constant 0 : index
      %13 = vector.load %arg7[%c0_11, %c0_12] : memref<8x128xf32, #tpu.memory_space<vmem>>, vector<8x128xf32>
      tpu.vector_store %arg7[%c0_11, %c0_12], %12 {strides = array<i32>} : memref<8x128xf32, #tpu.memory_space<vmem>>, vector<8x128xf32>,
    } else {
    }
    %c0 = arith.constant 0 : index
    %c0_1 = arith.constant 0 : index
    %3 = vector.load %arg7[%c0, %c0_1] : memref<8x128xf32, #tpu.memory_space<vmem>>, vector<8x128xf32>
    %c0_2 = arith.constant 0 : index
    %c0_3 = arith.constant 0 : index
    %4 = vector.load %arg3[%c0_2, %c0_3] : memref<8x128xbf16, #tpu.memory_space<vmem>>, vector<8x128xbf16>
    %c0_4 = arith.constant 0 : index
    %c0_5 = arith.constant 0 : index
    %5 = vector.load %arg4[%c0_4, %c0_5] : memref<128x128xbf16, #tpu.memory_space<vmem>>, vector<128x128xbf16>
    %cst = arith.constant dense<0.000000e+00> : vector<8x128xf32>
    %6 = tpu.matmul %4, %5, %cst {dimension_numbers = #tpu.dot_dimension_numbers<[1], [0], [0], [1], [0, 0, 1, 1], [], []>} : vector<8x128xbf16>, vector<128x128xbf16>, vector<8x128xf32> -> vector<8x128xf32>
    %7 = arith.addf %3, %6 : vector<8x128xf32>
    %c0_6 = arith.constant 0 : index
    %c0_7 = arith.constant 0 : index
    %8 = vector.load %arg7[%c0_6, %c0_7] : memref<8x128xf32, #tpu.memory_space<vmem>>, vector<8x128xf32>
    tpu.vector_store %arg7[%c0_6, %c0_7], %7 {strides = array<i32>} : memref<8x128xf32, #tpu.memory_space<vmem>>, vector<8x128xf32>,
    %c0_i32_8 = arith.constant 0 : i32
    %9 = arith.cmpi eq, %arg2, %c0_i32_8 : i32
    %10 = arith.extui %9 : i1 to i32
    %c0_i32_9 = arith.constant 0 : i32
    %11 = arith.cmpi ne, %10, %c0_i32_9 : i32
    scf.if %11 {
      %c0_10 = arith.constant 0 : index
      %c0_11 = arith.constant 0 : index
      %12 = vector.load %arg7[%c0_10, %c0_11] : memref<8x128xf32, #tpu.memory_space<vmem>>, vector<8x128xf32>
      %c0_12 = arith.constant 0 : index
      %c0_13 = arith.constant 0 : index
      %13 = vector.load %arg5[%c0_12, %c0_13] : memref<1x128xf32, #tpu.memory_space<vmem>>, vector<1x128xf32>
      %14 = vector.broadcast %13 : vector<1x128xf32> to vector<8x128xf32>
      %15 = arith.addf %12, %14 : vector<8x128xf32>
      %c0_14 = arith.constant 0 : index
      %c0_15 = arith.constant 0 : index
      %16 = vector.load %arg6[%c0_14, %c0_15] : memref<8x128xf32, #tpu.memory_space<vmem>>, vector<8x128xf32>
      tpu.vector_store %arg6[%c0_14, %c0_15], %15 {strides = array<i32>} : memref<8x128xf32, #tpu.memory_space<vmem>>, vector<8x128xf32>,
    } else {
    }
    return
  }
  func.func @transform_0(%arg0: i32, %arg1: i32, %arg2: i32) -> (i32, i32) {
    %c0_i32 = arith.constant 0 : i32
    return %arg1, %arg2 : i32, i32
  }
  func.func @transform_1(%arg0: i32, %arg1: i32, %arg2: i32) -> (i32, i32) {
    %c0_i32 = arith.constant 0 : i32
    return %arg2, %arg0 : i32, i32
  }
  func.func @transform_2(%arg0: i32, %arg1: i32, %arg2: i32) -> (i32, i32) {
    %c0_i32 = arith.constant 0 : i32
    %c0_i32_0 = arith.constant 0 : i32
    return %c0_i32, %arg0 : i32, i32
  }
  func.func @transform_3(%arg0: i32, %arg1: i32, %arg2: i32) -> (i32, i32) {
    %c0_i32 = arith.constant 0 : i32
    return %arg1, %arg0 : i32, i32
  }
}

</mosaic_0001>

<bundles_post_ra>
// kernel: my_compound_forward.1
= control target key start
LH: loop header
LB: loop body
LE: loop exit
PB: predicated region body
PF: predicated region fallthrough
CT: control target
= control target key end

     0   :  { %8 = vsyncpa [#allocation4], 0  ;;  %s233_s12 = smov [#allocation3]   ;;  %s270_s0 = inlined_call_operand.vmem [shape: bf16[8,128], index: 0, kind: input, shape index: {}]   ;;  %s271_s1 = inlined_call_operand.hbm [shape: bf16[128,128], index: 1, kind: input, shape index: {}]   ;;  %s272_s2 = inlined_call_operand.vmem [shape: f32[1,128], index: 2, kind: input, shape index: {}]   ;;  %s273_s3 = inlined_call_operand.vmem [shape: f32[8,128], index: 3, kind: output, shape index: {}]  }
   0x1   :  { %s16_s13 = sshll.u32 %s233_s12, 4  ;;  %s17_s13 = int_to_ptr.vmem [resolvable:$true] %s16_s13 }
   0x2   :  { %s219_s14 = scalar_lea.vmem %s17_s13, 1024  ;;  %p224_p1 = scmp.lt.s32.totalorder %s17_s13, %s17_s13 }
   0x3   :  { %p220_p0 = scmp.ne.s32.totalorder %s17_s13, %s219_s14  ;;  %p225_p2 = scmp.lt.s32.totalorder %s219_s14, %s219_s14 }
   0x5   :  { %p226_p3 = por %p225_p2, %p224_p1 }
   0x7   :  { %p227_p4 = pnand %p226_p3, %p220_p0 }
   0x9   :  { %230 = shalt.err (!%p227_p4)
}
   0xa   :  { %s234_s15 = smov 64   ;;  %s235_s16 = smov 4  }
   0xb   :  { %22 = dma.hbm_to_vmem [thread:$0]  %s271_s1, 1024, %s17_s13, [#allocation4], %s234_s15, %s234_s15, %s235_s16  }
   0xc   :  { %231 = dma.done.wait [#allocation4], 1024  }
   0xd   :  { %232 = vsyncadd [#allocation4], 4294966272  ;;  %v236_v0 = vmov 0.0   ;;  %vm237_vm0 = vmmov 0   ;;  %v203_v1 = vld [vmem:[#allocation3 + $0x38] sm:$0xff]   ;;  %v204_v2 = vld [vmem:[#allocation3 + $0x30] sm:$0xff]  }
   0xe   :  { %178 = vmatprep.subr.bf16.mxu0 %v236_v0  ;;  %194 = vmatprep.mubr.msk.bf16.mxu0 %vm237_vm0, %v236_v0  ;;  %v205_v3 = vld [vmem:[#allocation3 + $0x28] sm:$0xff]   ;;  %v206_v4 = vld [vmem:[#allocation3 + $0x20] sm:$0xff]   ;;  %v207_v5 = vld [vmem:[#allocation3 + $0x18] sm:$0xff]  }
   0xf   :  { %179 = vmatpush3.bf16.msra.mxu0 %v203_v1  ;;  %v208_v6 = vld [vmem:[#allocation3 + $0x10] sm:$0xff]   ;;  %v209_v7 = vld [vmem:[#allocation3 + $0x8] sm:$0xff]   ;;  %v210_v8 = vld [vmem:[#allocation3] sm:$0xff]  }
  0x10   :  { %180 = vmatprep.subr.bf16.mxu0 %v236_v0  ;;  %v35_v9 = vld [vmem:[%s270_s0] sm:$0xf] }
  0x11   :  { %v168_v10 = vld [vmem:[%s272_s2] ss:$0 sm:$0xff] }
  0x13   :  { %181 = vmatpush3.bf16.msra.mxu0 %v204_v2 }
  0x14   :  { %182 = vmatprep.subr.bf16.mxu0 %v236_v0 }
  0x17   :  { %183 = vmatpush3.bf16.msra.mxu0 %v205_v3 }
  0x18   :  { %184 = vmatprep.subr.bf16.mxu0 %v236_v0 }
  0x1b   :  { %185 = vmatpush3.bf16.msra.mxu0 %v206_v4 }
  0x1c   :  { %186 = vmatprep.subr.bf16.mxu0 %v236_v0 }
  0x1f   :  { %187 = vmatpush3.bf16.msra.mxu0 %v207_v5 }
  0x20   :  { %188 = vmatprep.subr.bf16.mxu0 %v236_v0 }
  0x23   :  { %189 = vmatpush3.bf16.msra.mxu0 %v208_v6 }
  0x24   :  { %190 = vmatprep.subr.bf16.mxu0 %v236_v0 }
  0x27   :  { %191 = vmatpush3.bf16.msra.mxu0 %v209_v7 }
  0x28   :  { %192 = vmatprep.subr.bf16.mxu0 %v236_v0 }
  0x2b   :  { %193 = vmatpush3.bf16.msra.mxu0 %v210_v8 }
  0x2e   :  { %195 = vmatmul.mubr.bf16.vlgmr.msra.gmra.mxu0 %v35_v9 }
  0xee   :  { %v134_v11 = vpop.f32.mrf.mxu0 }
  0xef   :  { %v153_v12 = vadd.f32 %v168_v10, %v134_v11 }
  0xf0   :  { %v196_v13 = vpop.f32.mrf.mxu0 }
  0xf1   :  { %154 = vst [vmem:[%s273_s3] sm:$0xff] %v153_v12 }
  0xf2   :  { %v137_v14 = vpop.f32.mrf.mxu0 }
  0xf4   :  { %v197_v15 = vpop.f32.mrf.mxu0 }
  0xf5   :  { %159 = vsyncpa [#allocation4], 1 }

</bundles_post_ra>
